<compile_context>
chip_gen: v6e
topology: v6e:2x2x1
jax: 0.10.0
libtpu: 0.0.40
codegen_flags: <defaults>
</compile_context>

<pallas_src>
import jax
import jax.numpy as jnp
from jax.experimental import pallas as pl
from jax.experimental.pallas import tpu as pltpu


def _round_up(x, m):
    return ((x + m - 1) // m) * m


def critic_kernel(obs_ref, act_ref, ln_g_ref, ln_b_ref,
                  w1h_ref, w1a_ref, b1_ref,
                  w2a_ref, w2b_ref, b2_ref,
                  w3_ref, b3_ref, q_ref):
    # ---- trunk: LayerNorm(feature_dim) + Tanh; bf16 input, f32 math ----
    x = obs_ref[...].astype(jnp.float32)                        # (tb, F)
    mean = jnp.mean(x, axis=-1, keepdims=True)
    var = jnp.mean(x * x, axis=-1, keepdims=True) - mean * mean  # one VPU pass
    h = (x - mean) * jax.lax.rsqrt(var + 1e-5)
    h = jnp.tanh(h * ln_g_ref[...] + ln_b_ref[...])

    # ---- layer 1, both heads fused along N (width 2H): bf16 MXU, f32 acc ----
    z1 = (jnp.dot(h.astype(jnp.bfloat16), w1h_ref[...],
                  preferred_element_type=jnp.float32)
          + jnp.dot(act_ref[...], w1a_ref[...],
                    preferred_element_type=jnp.float32)
          + b1_ref[...])
    z1 = jnp.maximum(z1, 0.0).astype(jnp.bfloat16)              # (tb, 2H)

    # ---- layer 2: one (tb,H)@(H,H) dot per head (no block-diag zero work) ----
    H = w2a_ref.shape[0]                                        # assumed %128==0
    z2a = jnp.maximum(jnp.dot(z1[:, :H], w2a_ref[...],
                              preferred_element_type=jnp.float32)
                      + b2_ref[0:1, :], 0.0)
    z2b = jnp.maximum(jnp.dot(z1[:, H:], w2b_ref[...],
                              preferred_element_type=jnp.float32)
                      + b2_ref[1:2, :], 0.0)

    # ---- layer 3 (Linear(H,1) per head): VPU mul + XLU lane reduction ----
    q1 = jnp.sum(z2a * w3_ref[0:1, :], axis=-1, keepdims=True)
    q2 = jnp.sum(z2b * w3_ref[1:2, :], axis=-1, keepdims=True)
    q_ref[...] = jnp.concatenate([q1, q2], axis=-1) + b3_ref[...]


def pack_critic_params(p, feature_dim, action_dim):
    """One-time wrapper-side fusion / layout prep of the two Q-heads' params."""
    F, A = feature_dim, action_dim
    H = p["q1_w2"].shape[0]
    A_pad = _round_up(A, 16)   # tiny pad to a bf16 sublane tile (~32 B / row)

    w1_both = jnp.concatenate([p["q1_w1"], p["q2_w1"]], axis=1)      # (F+A, 2H)
    w1h = w1_both[:F].astype(jnp.bfloat16)                           # (F, 2H)
    w1a = (jnp.zeros((A_pad, 2 * H), jnp.float32)
           .at[:A].set(w1_both[F:]).astype(jnp.bfloat16))            # (A_pad, 2H)
    b1 = jnp.concatenate([p["q1_b1"], p["q2_b1"]], axis=1)           # (1, 2H)

    w2a = p["q1_w2"].astype(jnp.bfloat16)                            # (H, H)
    w2b = p["q2_w2"].astype(jnp.bfloat16)                            # (H, H)
    b2 = jnp.concatenate([p["q1_b2"], p["q2_b2"]], axis=0)           # (2, H)

    w3 = jnp.concatenate([p["q1_w3"].T, p["q2_w3"].T], axis=0)       # (2, H) f32
    b3 = jnp.concatenate([p["q1_b3"], p["q2_b3"]], axis=1)           # (1, 2)

    return dict(ln_g=p["ln_g"], ln_b=p["ln_b"],
                w1h=w1h, w1a=w1a, b1=b1, w2a=w2a, w2b=w2b, b2=b2,
                w3=w3, b3=b3)


def critic_forward(obs, action, pp, *, tile_b=None):
    B, F = obs.shape
    A = action.shape[1]
    A_pad = pp["w1a"].shape[0]
    H2 = pp["b1"].shape[1]                     # 2 * hidden_dim
    H = H2 // 2

    # ---- batch tiling: multiple of 8; >=2 grid steps for large B (v7x's two
    # TensorCores via "parallel"); capped so f32 activations stay a few MiB
    # (v5e scoped-VMEM safe) while amortizing per-step overhead (v6e). ----
    if tile_b is None:
        b8 = _round_up(B, 8)
        per_row = 4 * (F + 3 * H2)                           # ~f32 bytes / row
        cap = max(128, min(1024, (8 << 20) // per_row))
        tile_b = b8 if b8 <= 256 else min(cap, _round_up(pl.cdiv(b8, 2), 8))
    tile_b = max(8, _round_up(min(tile_b, _round_up(B, 8)), 8))
    B_pad = _round_up(B, tile_b)

    # ---- inputs: bf16, action padded only to A_pad lanes, batch padded so
    # every block (incl. the last one) is in-bounds. ----
    obs_bf = obs.astype(jnp.bfloat16)
    act_bf = jnp.zeros((B, A_pad), jnp.bfloat16).at[:, :A].set(
        action.astype(jnp.bfloat16))
    if B_pad != B:
        obs_bf = jnp.pad(obs_bf, ((0, B_pad - B), (0, 0)))
        act_bf = jnp.pad(act_bf, ((0, B_pad - B), (0, 0)))

    def resident(shape):                 # grid-invariant -> VMEM-resident block
        return pl.BlockSpec(shape, lambda i: (0, 0))

    q = pl.pallas_call(
        critic_kernel,
        out_shape=jax.ShapeDtypeStruct((B_pad, 2), jnp.float32),
        grid=(B_pad // tile_b,),
        in_specs=[
            pl.BlockSpec((tile_b, F), lambda i: (i, 0)),      # obs (bf16)
            pl.BlockSpec((tile_b, A_pad), lambda i: (i, 0)),  # action (bf16)
            resident((1, F)), resident((1, F)),               # ln_g, ln_b
            resident((F, H2)), resident((A_pad, H2)),         # w1h, w1a
            resident((1, H2)),                                # b1
            resident((H, H)), resident((H, H)),               # w2a, w2b
            resident((2, H)),                                 # b2
            resident((2, H)), resident((1, 2)),               # w3, b3
        ],
        out_specs=pl.BlockSpec((tile_b, 2), lambda i: (i, 0)),
        compiler_params=pltpu.CompilerParams(
            dimension_semantics=("parallel",),
            vmem_limit_bytes=48 << 20),
    )(obs_bf, act_bf, pp["ln_g"], pp["ln_b"], pp["w1h"], pp["w1a"], pp["b1"],
      pp["w2a"], pp["w2b"], pp["b2"], pp["w3"], pp["b3"])

    q = q[:B]
    return q[:, 0:1], q[:, 1:2]


def make_params(key, feature_dim, action_dim, hidden_dim):
    # TODO(synk): original module uses utils.network_init (orthogonal init);
    # plain uniform Linear-style init is used here — forward math is identical.
    ks = jax.random.split(key, 6)

    def linear(k, fan_in, fan_out):
        kw, kb = jax.random.split(k)
        lim = 1.0 / jnp.sqrt(fan_in)
        w = jax.random.uniform(kw, (fan_in, fan_out), jnp.float32, -lim, lim)
        b = jax.random.uniform(kb, (1, fan_out), jnp.float32, -lim, lim)
        return w, b

    p = {"ln_g": jnp.ones((1, feature_dim), jnp.float32),
         "ln_b": jnp.zeros((1, feature_dim), jnp.float32)}
    i = 0
    for head in ("q1", "q2"):
        w1, b1 = linear(ks[i], feature_dim + action_dim, hidden_dim); i += 1
        w2, b2 = linear(ks[i], hidden_dim, hidden_dim); i += 1
        w3, b3 = linear(ks[i], hidden_dim, 1); i += 1
        p.update({f"{head}_w1": w1, f"{head}_b1": b1,
                  f"{head}_w2": w2, f"{head}_b2": b2,
                  f"{head}_w3": w3, f"{head}_b3": b3})
    return p


def critic_reference(obs, action, p, dot_dtype=jnp.float32):
    """Pure-JAX reference with the original (unfused) parameter layout."""
    x = obs.astype(jnp.float32)
    mean = jnp.mean(x, axis=-1, keepdims=True)
    var = jnp.mean((x - mean) ** 2, axis=-1, keepdims=True)
    h = (x - mean) * jax.lax.rsqrt(var + 1e-5)
    h = jnp.tanh(h * p["ln_g"] + p["ln_b"])
    ha = jnp.concatenate([h, action.astype(jnp.float32)], axis=-1)

    def head(pref):
        z = jnp.dot(ha.astype(dot_dtype), p[f"{pref}_w1"].astype(dot_dtype),
                    preferred_element_type=jnp.float32) + p[f"{pref}_b1"]
        z = jnp.maximum(z, 0.0)
        z = jnp.dot(z.astype(dot_dtype), p[f"{pref}_w2"].astype(dot_dtype),
                    preferred_element_type=jnp.float32) + p[f"{pref}_b2"]
        z = jnp.maximum(z, 0.0)
        return jnp.dot(z, p[f"{pref}_w3"],
                       preferred_element_type=jnp.float32) + p[f"{pref}_b3"]

    return head("q1"), head("q2")


if __name__ == "__main__":
    B, FEAT, ACT, HID = 8, 64, 6, 128

    key = jax.random.PRNGKey(0)
    k_obs, k_act, k_par = jax.random.split(key, 3)
    obs = jax.random.normal(k_obs, (B, FEAT), jnp.float32)
    action = jax.random.normal(k_act, (B, ACT), jnp.float32)
    params = make_params(k_par, FEAT, ACT, HID)
    packed = pack_critic_params(params, FEAT, ACT)

    q1, q2 = critic_forward(obs, action, packed)
    q1 = jax.block_until_ready(q1)
    q2 = jax.block_until_ready(q2)
    assert q1.shape == (B, 1) and q2.shape == (B, 1)

    # Tight check against a reference that mirrors the kernel's bf16 rounding
    # (bf16 obs + bf16 MXU operands, f32 LN/accumulation math).
    obs_bf = obs.astype(jnp.bfloat16).astype(jnp.float32)
    r1_bf, r2_bf = critic_reference(obs_bf, action, params, dot_dtype=jnp.bfloat16)
    assert jnp.allclose(q1, r1_bf, atol=2e-2, rtol=2e-2)
    assert jnp.allclose(q2, r2_bf, atol=2e-2, rtol=2e-2)

    # Looser sanity check against full-f32 semantics.
    r1_f, r2_f = critic_reference(obs, action, params, dot_dtype=jnp.float32)
    assert jnp.allclose(q1, r1_f, atol=1e-1, rtol=1e-1)
    assert jnp.allclose(q2, r2_f, atol=1e-1, rtol=1e-1)

    print("KERNEL_OK")
</pallas_src>

<mosaic_0001>
module attributes {stable_mosaic.version = 11 : i64} {
  func.func @critic_kernel(%arg0: i32, %arg1: memref<8x64xbf16, #tpu.memory_space<vmem>>, %arg2: memref<8x16xbf16, #tpu.memory_space<vmem>>, %arg3: memref<1x64xf32, #tpu.memory_space<vmem>>, %arg4: memref<1x64xf32, #tpu.memory_space<vmem>>, %arg5: memref<64x256xbf16, #tpu.memory_space<vmem>>, %arg6: memref<16x256xbf16, #tpu.memory_space<vmem>>, %arg7: memref<1x256xf32, #tpu.memory_space<vmem>>, %arg8: memref<128x128xbf16, #tpu.memory_space<vmem>>, %arg9: memref<128x128xbf16, #tpu.memory_space<vmem>>, %arg10: memref<2x128xf32, #tpu.memory_space<vmem>>, %arg11: memref<2x128xf32, #tpu.memory_space<vmem>>, %arg12: memref<1x2xf32, #tpu.memory_space<vmem>>, %arg13: memref<8x2xf32, #tpu.memory_space<vmem>>) attributes {dimension_semantics = [#tpu.dimension_semantics<parallel>], iteration_bounds = array<i64: 1>, scalar_prefetch = 0 : i64, scratch_operands = 0 : i64, tpu.core_type = #tpu.core_type<tc>, window_params = [{transform_indices = @transform_0, window_bounds = array<i64: 8, 64>}, {transform_indices = @transform_1, window_bounds = array<i64: 8, 16>}, {pipeline_mode = #tpu.pipeline_mode<synchronous>, transform_indices = @transform_2, window_bounds = array<i64: 1, 64>}, {pipeline_mode = #tpu.pipeline_mode<synchronous>, transform_indices = @transform_3, window_bounds = array<i64: 1, 64>}, {pipeline_mode = #tpu.pipeline_mode<synchronous>, transform_indices = @transform_4, window_bounds = array<i64: 64, 256>}, {pipeline_mode = #tpu.pipeline_mode<synchronous>, transform_indices = @transform_5, window_bounds = array<i64: 16, 256>}, {pipeline_mode = #tpu.pipeline_mode<synchronous>, transform_indices = @transform_6, window_bounds = array<i64: 1, 256>}, {pipeline_mode = #tpu.pipeline_mode<synchronous>, transform_indices = @transform_7, window_bounds = array<i64: 128, 128>}, {pipeline_mode = #tpu.pipeline_mode<synchronous>, transform_indices = @transform_8, window_bounds = array<i64: 128, 128>}, {pipeline_mode = #tpu.pipeline_mode<synchronous>, transform_indices = @transform_9, window_bounds = array<i64: 2, 128>}, {pipeline_mode = #tpu.pipeline_mode<synchronous>, transform_indices = @transform_10, window_bounds = array<i64: 2, 128>}, {pipeline_mode = #tpu.pipeline_mode<synchronous>, transform_indices = @transform_11, window_bounds = array<i64: 1, 2>}, {transform_indices = @transform_12, window_bounds = array<i64: 8, 2>}]} {
    %c0 = arith.constant 0 : index
    %c0_0 = arith.constant 0 : index
    %0 = vector.load %arg1[%c0, %c0_0] : memref<8x64xbf16, #tpu.memory_space<vmem>>, vector<8x64xbf16>
    %1 = arith.extf %0 : vector<8x64xbf16> to vector<8x64xf32>
    %cst = arith.constant dense<0.000000e+00> : vector<8xf32>
    %2 = vector.multi_reduction <add>, %1, %cst [1] : vector<8x64xf32> to vector<8xf32>
    %3 = vector.shape_cast %2 : vector<8xf32> to vector<8x1xf32>
    %cst_1 = arith.constant 6.400000e+01 : f32
    %4 = vector.broadcast %cst_1 : f32 to vector<8x1xf32>
    %5 = arith.divf %3, %4 : vector<8x1xf32>
    %6 = arith.mulf %1, %1 : vector<8x64xf32>
    %cst_2 = arith.constant dense<0.000000e+00> : vector<8xf32>
    %7 = vector.multi_reduction <add>, %6, %cst_2 [1] : vector<8x64xf32> to vector<8xf32>
    %8 = vector.shape_cast %7 : vector<8xf32> to vector<8x1xf32>
    %cst_3 = arith.constant 6.400000e+01 : f32
    %9 = vector.broadcast %cst_3 : f32 to vector<8x1xf32>
    %10 = arith.divf %8, %9 : vector<8x1xf32>
    %11 = arith.mulf %5, %5 : vector<8x1xf32>
    %12 = arith.subf %10, %11 : vector<8x1xf32>
    %13 = vector.broadcast %5 : vector<8x1xf32> to vector<8x64xf32>
    %14 = arith.subf %1, %13 : vector<8x64xf32>
    %cst_4 = arith.constant 9.99999974E-6 : f32
    %15 = vector.broadcast %cst_4 : f32 to vector<8x1xf32>
    %16 = arith.addf %12, %15 : vector<8x1xf32>
    %17 = math.rsqrt %16 : vector<8x1xf32>
    %18 = vector.broadcast %17 : vector<8x1xf32> to vector<8x64xf32>
    %19 = arith.mulf %14, %18 : vector<8x64xf32>
    %c0_5 = arith.constant 0 : index
    %c0_6 = arith.constant 0 : index
    %20 = vector.load %arg3[%c0_5, %c0_6] : memref<1x64xf32, #tpu.memory_space<vmem>>, vector<1x64xf32>
    %21 = vector.broadcast %20 : vector<1x64xf32> to vector<8x64xf32>
    %22 = arith.mulf %19, %21 : vector<8x64xf32>
    %c0_7 = arith.constant 0 : index
    %c0_8 = arith.constant 0 : index
    %23 = vector.load %arg4[%c0_7, %c0_8] : memref<1x64xf32, #tpu.memory_space<vmem>>, vector<1x64xf32>
    %24 = vector.broadcast %23 : vector<1x64xf32> to vector<8x64xf32>
    %25 = arith.addf %22, %24 : vector<8x64xf32>
    %26 = math.tanh %25 : vector<8x64xf32>
    %27 = arith.truncf %26 : vector<8x64xf32> to vector<8x64xbf16>
    %c0_9 = arith.constant 0 : index
    %c0_10 = arith.constant 0 : index
    %28 = vector.load %arg5[%c0_9, %c0_10] : memref<64x256xbf16, #tpu.memory_space<vmem>>, vector<64x256xbf16>
    %cst_11 = arith.constant dense<0.000000e+00> : vector<8x256xf32>
    %29 = tpu.matmul %27, %28, %cst_11 {dimension_numbers = #tpu.dot_dimension_numbers<[1], [0], [0], [1], [0, 0, 1, 1], [], []>} : vector<8x64xbf16>, vector<64x256xbf16>, vector<8x256xf32> -> vector<8x256xf32>
    %c0_12 = arith.constant 0 : index
    %c0_13 = arith.constant 0 : index
    %30 = vector.load %arg2[%c0_12, %c0_13] : memref<8x16xbf16, #tpu.memory_space<vmem>>, vector<8x16xbf16>
    %c0_14 = arith.constant 0 : index
    %c0_15 = arith.constant 0 : index
    %31 = vector.load %arg6[%c0_14, %c0_15] : memref<16x256xbf16, #tpu.memory_space<vmem>>, vector<16x256xbf16>
    %cst_16 = arith.constant dense<0.000000e+00> : vector<8x256xf32>
    %32 = tpu.matmul %30, %31, %cst_16 {dimension_numbers = #tpu.dot_dimension_numbers<[1], [0], [0], [1], [0, 0, 1, 1], [], []>} : vector<8x16xbf16>, vector<16x256xbf16>, vector<8x256xf32> -> vector<8x256xf32>
    %33 = arith.addf %29, %32 : vector<8x256xf32>
    %c0_17 = arith.constant 0 : index
    %c0_18 = arith.constant 0 : index
    %34 = vector.load %arg7[%c0_17, %c0_18] : memref<1x256xf32, #tpu.memory_space<vmem>>, vector<1x256xf32>
    %35 = vector.broadcast %34 : vector<1x256xf32> to vector<8x256xf32>
    %36 = arith.addf %33, %35 : vector<8x256xf32>
    %cst_19 = arith.constant 0.000000e+00 : f32
    %37 = vector.broadcast %cst_19 : f32 to vector<8x256xf32>
    %38 = arith.maximumf %36, %37 : vector<8x256xf32>
    %39 = arith.truncf %38 : vector<8x256xf32> to vector<8x256xbf16>
    %40 = vector.extract_strided_slice %39 {offsets = [0, 0], sizes = [8, 128], strides = [1, 1]} : vector<8x256xbf16> to vector<8x128xbf16>
    %c0_20 = arith.constant 0 : index
    %c0_21 = arith.constant 0 : index
    %41 = vector.load %arg8[%c0_20, %c0_21] : memref<128x128xbf16, #tpu.memory_space<vmem>>, vector<128x128xbf16>
    %cst_22 = arith.constant dense<0.000000e+00> : vector<8x128xf32>
    %42 = tpu.matmul %40, %41, %cst_22 {dimension_numbers = #tpu.dot_dimension_numbers<[1], [0], [0], [1], [0, 0, 1, 1], [], []>} : vector<8x128xbf16>, vector<128x128xbf16>, vector<8x128xf32> -> vector<8x128xf32>
    %c0_23 = arith.constant 0 : index
    %c0_24 = arith.constant 0 : index
    %43 = vector.load %arg10[%c0_23, %c0_24] : memref<2x128xf32, #tpu.memory_space<vmem>>, vector<1x128xf32>
    %44 = vector.broadcast %43 : vector<1x128xf32> to vector<8x128xf32>
    %45 = arith.addf %42, %44 : vector<8x128xf32>
    %cst_25 = arith.constant 0.000000e+00 : f32
    %46 = vector.broadcast %cst_25 : f32 to vector<8x128xf32>
    %47 = arith.maximumf %45, %46 : vector<8x128xf32>
    %48 = vector.extract_strided_slice %39 {offsets = [0, 128], sizes = [8, 128], strides = [1, 1]} : vector<8x256xbf16> to vector<8x128xbf16>
    %c0_26 = arith.constant 0 : index
    %c0_27 = arith.constant 0 : index
    %49 = vector.load %arg9[%c0_26, %c0_27] : memref<128x128xbf16, #tpu.memory_space<vmem>>, vector<128x128xbf16>
    %cst_28 = arith.constant dense<0.000000e+00> : vector<8x128xf32>
    %50 = tpu.matmul %48, %49, %cst_28 {dimension_numbers = #tpu.dot_dimension_numbers<[1], [0], [0], [1], [0, 0, 1, 1], [], []>} : vector<8x128xbf16>, vector<128x128xbf16>, vector<8x128xf32> -> vector<8x128xf32>
    %c1 = arith.constant 1 : index
    %c0_29 = arith.constant 0 : index
    %51 = vector.load %arg10[%c1, %c0_29] : memref<2x128xf32, #tpu.memory_space<vmem>>, vector<1x128xf32>
    %52 = vector.broadcast %51 : vector<1x128xf32> to vector<8x128xf32>
    %53 = arith.addf %50, %52 : vector<8x128xf32>
    %cst_30 = arith.constant 0.000000e+00 : f32
    %54 = vector.broadcast %cst_30 : f32 to vector<8x128xf32>
    %55 = arith.maximumf %53, %54 : vector<8x128xf32>
    %c0_31 = arith.constant 0 : index
    %c0_32 = arith.constant 0 : index
    %56 = vector.load %arg11[%c0_31, %c0_32] : memref<2x128xf32, #tpu.memory_space<vmem>>, vector<1x128xf32>
    %57 = vector.broadcast %56 : vector<1x128xf32> to vector<8x128xf32>
    %58 = arith.mulf %47, %57 : vector<8x128xf32>
    %cst_33 = arith.constant dense<0.000000e+00> : vector<8xf32>
    %59 = vector.multi_reduction <add>, %58, %cst_33 [1] : vector<8x128xf32> to vector<8xf32>
    %60 = vector.shape_cast %59 : vector<8xf32> to vector<8x1xf32>
    %c1_34 = arith.constant 1 : index
    %c0_35 = arith.constant 0 : index
    %61 = vector.load %arg11[%c1_34, %c0_35] : memref<2x128xf32, #tpu.memory_space<vmem>>, vector<1x128xf32>
    %62 = vector.broadcast %61 : vector<1x128xf32> to vector<8x128xf32>
    %63 = arith.mulf %55, %62 : vector<8x128xf32>
    %cst_36 = arith.constant dense<0.000000e+00> : vector<8xf32>
    %64 = vector.multi_reduction <add>, %63, %cst_36 [1] : vector<8x128xf32> to vector<8xf32>
    %65 = vector.shape_cast %64 : vector<8xf32> to vector<8x1xf32>
    %66 = tpu.concatenate %60, %65 in 1 : vector<8x1xf32>, vector<8x1xf32> -> vector<8x2xf32>
    %c0_37 = arith.constant 0 : index
    %c0_38 = arith.constant 0 : index
    %67 = vector.load %arg12[%c0_37, %c0_38] : memref<1x2xf32, #tpu.memory_space<vmem>>, vector<1x2xf32>
    %68 = vector.broadcast %67 : vector<1x2xf32> to vector<8x2xf32>
    %69 = arith.addf %66, %68 : vector<8x2xf32>
    %c0_39 = arith.constant 0 : index
    %c0_40 = arith.constant 0 : index
    %70 = vector.load %arg13[%c0_39, %c0_40] : memref<8x2xf32, #tpu.memory_space<vmem>>, vector<8x2xf32>
    tpu.vector_store %arg13[%c0_39, %c0_40], %69 {strides = array<i32>} : memref<8x2xf32, #tpu.memory_space<vmem>>, vector<8x2xf32>,
    return
  }
  func.func @transform_0(%arg0: i32) -> (i32, i32) {
    %c0_i32 = arith.constant 0 : i32
    %c0_i32_0 = arith.constant 0 : i32
    return %arg0, %c0_i32 : i32, i32
  }
  func.func @transform_1(%arg0: i32) -> (i32, i32) {
    %c0_i32 = arith.constant 0 : i32
    %c0_i32_0 = arith.constant 0 : i32
    return %arg0, %c0_i32 : i32, i32
  }
  func.func @transform_2(%arg0: i32) -> (i32, i32) {
    %c0_i32 = arith.constant 0 : i32
    %c0_i32_0 = arith.constant 0 : i32
    %c0_i32_1 = arith.constant 0 : i32
    return %c0_i32, %c0_i32_0 : i32, i32
  }
  func.func @transform_3(%arg0: i32) -> (i32, i32) {
    %c0_i32 = arith.constant 0 : i32
    %c0_i32_0 = arith.constant 0 : i32
    %c0_i32_1 = arith.constant 0 : i32
    return %c0_i32, %c0_i32_0 : i32, i32
  }
  func.func @transform_4(%arg0: i32) -> (i32, i32) {
    %c0_i32 = arith.constant 0 : i32
    %c0_i32_0 = arith.constant 0 : i32
    %c0_i32_1 = arith.constant 0 : i32
    return %c0_i32, %c0_i32_0 : i32, i32
  }
  func.func @transform_5(%arg0: i32) -> (i32, i32) {
    %c0_i32 = arith.constant 0 : i32
    %c0_i32_0 = arith.constant 0 : i32
    %c0_i32_1 = arith.constant 0 : i32
    return %c0_i32, %c0_i32_0 : i32, i32
  }
  func.func @transform_6(%arg0: i32) -> (i32, i32) {
    %c0_i32 = arith.constant 0 : i32
    %c0_i32_0 = arith.constant 0 : i32
    %c0_i32_1 = arith.constant 0 : i32
    return %c0_i32, %c0_i32_0 : i32, i32
  }
  func.func @transform_7(%arg0: i32) -> (i32, i32) {
    %c0_i32 = arith.constant 0 : i32
    %c0_i32_0 = arith.constant 0 : i32
    %c0_i32_1 = arith.constant 0 : i32
    return %c0_i32, %c0_i32_0 : i32, i32
  }
  func.func @transform_8(%arg0: i32) -> (i32, i32) {
    %c0_i32 = arith.constant 0 : i32
    %c0_i32_0 = arith.constant 0 : i32
    %c0_i32_1 = arith.constant 0 : i32
    return %c0_i32, %c0_i32_0 : i32, i32
  }
  func.func @transform_9(%arg0: i32) -> (i32, i32) {
    %c0_i32 = arith.constant 0 : i32
    %c0_i32_0 = arith.constant 0 : i32
    %c0_i32_1 = arith.constant 0 : i32
    return %c0_i32, %c0_i32_0 : i32, i32
  }
  func.func @transform_10(%arg0: i32) -> (i32, i32) {
    %c0_i32 = arith.constant 0 : i32
    %c0_i32_0 = arith.constant 0 : i32
    %c0_i32_1 = arith.constant 0 : i32
    return %c0_i32, %c0_i32_0 : i32, i32
  }
  func.func @transform_11(%arg0: i32) -> (i32, i32) {
    %c0_i32 = arith.constant 0 : i32
    %c0_i32_0 = arith.constant 0 : i32
    %c0_i32_1 = arith.constant 0 : i32
    return %c0_i32, %c0_i32_0 : i32, i32
  }
  func.func @transform_12(%arg0: i32) -> (i32, i32) {
    %c0_i32 = arith.constant 0 : i32
    %c0_i32_0 = arith.constant 0 : i32
    return %arg0, %c0_i32 : i32, i32
  }
}

</mosaic_0001>

<bundles_post_ra>
// kernel: tpu_custom_call.1
= control target key start
LH: loop header
LB: loop body
LE: loop exit
PB: predicated region body
PF: predicated region fallthrough
CT: control target
= control target key end

     0   :  { %17 = vsyncpa [#allocation3], 0  ;;  %s1045_s0 = inlined_call_operand.hbm [shape: bf16[8,64], index: 0, kind: input, shape index: {}]   ;;  %s1046_s1 = inlined_call_operand.hbm [shape: bf16[8,16], index: 1, kind: input, shape index: {}]   ;;  %s1047_s2 = inlined_call_operand.vmem [shape: f32[1,64], index: 2, kind: input, shape index: {}]   ;;  %s1048_s3 = inlined_call_operand.hbm [shape: f32[1,64], index: 3, kind: input, shape index: {}]   ;;  %s1049_s4 = inlined_call_operand.hbm [shape: bf16[64,256], index: 4, kind: input, shape index: {}]   ;;  %s1050_s5 = inlined_call_operand.hbm [shape: bf16[16,256], index: 5, kind: input, shape index: {}]   ;;  %s1051_s6 = inlined_call_operand.vmem [shape: f32[1,256], index: 6, kind: input, shape index: {}]   ;;  %s1052_s7 = inlined_call_operand.hbm [shape: bf16[128,128], index: 7, kind: input, shape index: {}]   ;;  %s1053_s8 = inlined_call_operand.hbm [shape: bf16[128,128], index: 8, kind: input, shape index: {}]   ;;  %s1054_s9 = inlined_call_operand.vmem [shape: f32[2,128], index: 9, kind: input, shape index: {}]   ;;  %s1055_s10 = inlined_call_operand.vmem [shape: f32[2,128], index: 10, kind: input, shape index: {}]   ;;  %s1056_s11 = inlined_call_operand.vmem [shape: f32[1,2], index: 11, kind: input, shape index: {}]   ;;  %s1057_s12 = inlined_call_operand.vmem [shape: f32[8,2], index: 12, kind: output, shape index: {}]  }
   0x1   :  { %18 = vsyncpa [#allocation5], 0 }
   0x2   :  { %19 = vsyncpa [#allocation8], 0 }
   0x3   :  { %20 = vsyncpa [#allocation11], 0  ;;  %s882_s21 = smov [#allocation4]   ;;  %s883_s23 = smov [#allocation7]  }
   0x4   :  { %s37_s22 = sshll.u32 %s882_s21, 4  ;;  %s58_s24 = sshll.u32 %s883_s23, 4  ;;  %s38_s22 = int_to_ptr.vmem [resolvable:$true] %s37_s22  ;;  %s59_s24 = int_to_ptr.vmem [resolvable:$true] %s58_s24 }
   0x5   :  { %s742_s25 = scalar_lea.vmem %s38_s22, 64  ;;  %p747_p1 = scmp.lt.s32.totalorder %s38_s22, %s38_s22 }
   0x6   :  { %p743_p0 = scmp.ne.s32.totalorder %s38_s22, %s742_s25  ;;  %p748_p2 = scmp.lt.s32.totalorder %s742_s25, %s742_s25 }
   0x8   :  { %p749_p3 = por %p748_p2, %p747_p1 }
   0xa   :  { %p750_p4 = pnand %p749_p3, %p743_p0 }
   0xc   :  { %753 = shalt.err (!%p750_p4)
}
   0xd   :  { %40 = dma.hbm_to_vmem [thread:$0]  %s1046_s1, 64, %s38_s22, [#allocation5]  }
   0xe   :  { %s762_s28 = scalar_lea.vmem %s59_s24, 1024  ;;  %p767_p6 = scmp.lt.s32.totalorder %s59_s24, %s59_s24 }
   0xf   :  { %p763_p5 = scmp.ne.s32.totalorder %s59_s24, %s762_s28  ;;  %p768_p7 = scmp.lt.s32.totalorder %s762_s28, %s762_s28 }
  0x11   :  { %p769_p8 = por %p768_p7, %p767_p6 }
  0x13   :  { %p770_p9 = pnand %p769_p8, %p763_p5 }
  0x15   :  { %773 = shalt.err (!%p770_p9)
}
  0x16   :  { %s884_s29 = smov 128   ;;  %s885_s30 = smov 8  }
  0x17   :  { %64 = dma.hbm_to_vmem [thread:$0]  %s1049_s4, 1024, %s59_s24, [#allocation8], %s884_s29, %s884_s29, %s885_s30  }
  0x18   :  { %s886_s15 = smov [#allocation10]  }
  0x19   :  { %s84_s16 = sshll.u32 %s886_s15, 4  ;;  %s85_s16 = int_to_ptr.vmem [resolvable:$true] %s84_s16 }
  0x1a   :  { %s782_s1 = scalar_lea.vmem %s85_s16, 1024  ;;  %p787_p11 = scmp.lt.s32.totalorder %s85_s16, %s85_s16 }
  0x1b   :  { %p783_p10 = scmp.ne.s32.totalorder %s85_s16, %s782_s1  ;;  %p788_p12 = scmp.lt.s32.totalorder %s782_s1, %s782_s1 }
  0x1d   :  { %p789_p13 = por %p788_p12, %p787_p11 }
  0x1f   :  { %p790_p0 = pnand %p789_p13, %p783_p10 }
  0x21   :  { %793 = shalt.err (!%p790_p0)
}
  0x22   :  { %s887_s17 = smov 64   ;;  %s888_s18 = smov 4  }
  0x23   :  { %90 = dma.hbm_to_vmem [thread:$0]  %s1052_s7, 1024, %s85_s16, [#allocation11], %s887_s17, %s887_s17, %s888_s18  }
  0x24   :  { %s889_s4 = smov [#allocation2]   ;;  %s890_s22 = smov [#allocation6]  }
  0x25   :  { %s27_s21 = sshll.u32 %s889_s4, 4  ;;  %s49_s23 = sshll.u32 %s890_s22, 4  ;;  %s28_s21 = int_to_ptr.vmem [resolvable:$true] %s27_s21  ;;  %s50_s23 = int_to_ptr.vmem [resolvable:$true] %s49_s23 }
  0x26   :  { %s802_s24 = scalar_lea.vmem %s28_s21, 64  ;;  %p807_p2 = scmp.lt.s32.totalorder %s28_s21, %s28_s21 }
  0x27   :  { %p803_p1 = scmp.ne.s32.totalorder %s28_s21, %s802_s24  ;;  %p808_p3 = scmp.lt.s32.totalorder %s802_s24, %s802_s24 }
  0x29   :  { %p809_p4 = por %p808_p3, %p807_p2 }
  0x2b   :  { %p810_p5 = pnand %p809_p4, %p803_p1 }
  0x2d   :  { %813 = shalt.err (!%p810_p5)
}
  0x2e   :  { %30 = dma.hbm_to_vmem [thread:$0]  %s1045_s0, 64, %s28_s21, [#allocation3]  }
  0x2f   :  { %s822_s27 = scalar_lea.vmem %s50_s23, 16  ;;  %s826_s7 = scalar_lea.vmem %s50_s23, 32 }
  0x30   :  { %p823_p6 = scmp.ne.s32.totalorder %s50_s23, %s822_s27  ;;  %p827_p7 = scmp.lt.s32.totalorder %s50_s23, %s50_s23 }
  0x31   :  { %p828_p8 = scmp.lt.s32.totalorder %s826_s7, %s822_s27 }
  0x33   :  { %p829_p9 = por %p828_p8, %p827_p7 }
  0x35   :  { %p830_p10 = pnand %p829_p9, %p823_p6 }
  0x37   :  { %833 = shalt.err (!%p830_p10)
}
  0x38   :  { %52 = dma.hbm_to_vmem [thread:$0]  %s1048_s3, 16, %s50_s23, [#allocation5]  }
  0x39   :  { %s891_s14 = smov [#allocation9]   ;;  %s892_s16 = smov [#allocation12]  }
  0x3a   :  { %s70_s15 = sshll.u32 %s891_s14, 4  ;;  %s96_s1 = sshll.u32 %s892_s16, 4  ;;  %s71_s15 = int_to_ptr.vmem [resolvable:$true] %s70_s15  ;;  %s97_s1 = int_to_ptr.vmem [resolvable:$true] %s96_s1 }
  0x3b   :  { %s842_s19 = scalar_lea.vmem %s71_s15, 256  ;;  %p847_p12 = scmp.lt.s32.totalorder %s71_s15, %s71_s15 }
  0x3c   :  { %p843_p11 = scmp.ne.s32.totalorder %s71_s15, %s842_s19  ;;  %p848_p13 = scmp.lt.s32.totalorder %s842_s19, %s842_s19 }
  0x3e   :  { %p849_p0 = por %p848_p13, %p847_p12 }
  0x40   :  { %p850_p1 = pnand %p849_p0, %p843_p11 }
  0x42   :  { %853 = shalt.err (!%p850_p1)
}
  0x43   :  { %76 = dma.hbm_to_vmem [thread:$0]  %s1050_s5, 256, %s71_s15, [#allocation8], %s884_s29, %s884_s29, %s885_s30  }
  0x44   :  { %s862_s3 = scalar_lea.vmem %s97_s1, 1024  ;;  %p867_p3 = scmp.lt.s32.totalorder %s97_s1, %s97_s1 }
  0x45   :  { %p863_p2 = scmp.ne.s32.totalorder %s97_s1, %s862_s3  ;;  %p868_p4 = scmp.lt.s32.totalorder %s862_s3, %s862_s3 }
  0x47   :  { %p869_p5 = por %p868_p4, %p867_p3 }
  0x49   :  { %p870_p6 = pnand %p869_p5, %p863_p2 }
  0x4b   :  { %873 = shalt.err (!%p870_p6)
}
  0x4c   :  { %102 = dma.hbm_to_vmem [thread:$0]  %s1053_s8, 1024, %s97_s1, [#allocation11], %s887_s17, %s887_s17, %s888_s18  }
  0x4d   :  { %874 = dma.done.wait [#allocation3], 64  }
  0x4e   :  { %875 = vsyncadd [#allocation3], 4294967232 }
  0x4f   :  { %876 = dma.done.wait [#allocation5], 80  }
  0x50   :  { %877 = vsyncadd [#allocation5], 4294967216 }
  0x51   :  { %878 = dma.done.wait [#allocation8], 1280  }
  0x52   :  { %879 = vsyncadd [#allocation8], 4294966016 }
  0x53   :  { %880 = dma.done.wait [#allocation11], 2048  }
  0x54   :  { %881 = vsyncadd [#allocation11], 4294965248  ;;  %v131_v0 = vld [vmem:[#allocation2] sm:$0xf]  ;;  %vm133_vm0 = vcmask 523264   ;;  %vm189_vm1 = vcmask 130048   ;;  %v320_v54 = vlaneseq }
  0x55   :  { %v994_v1 = vunpack.c.l.bf16 %v131_v0  ;;  %v699_v5 = vld [vmem:[#allocation7 + $0x34] ss:$8 sps:$4 sm:$0xff]   ;;  %v701_v6 = vld [vmem:[#allocation7 + $0x30] ss:$8 sps:$4 sm:$0xff]   ;;  %v702_v7 = vld [vmem:[#allocation7 + $0x24] ss:$8 sps:$4 sm:$0xff]  }
  0x56   :  { %v705_v8 = vld [vmem:[#allocation9 + $0x4] ss:$8 sps:$4 sm:$0xff]   ;;  %v707_v9 = vld [vmem:[#allocation9] ss:$8 sps:$4 sm:$0xff]   ;;  %285 = vmatprep.subr.bf16.mxu1 %v699_v5  ;;  %v708_v11 = vld [vmem:[#allocation7 + $0x14] ss:$8 sps:$4 sm:$0xff]  }
  0x57   :  { %v134_v2 = vsel %vm133_vm0, %v994_v1, 0.0  ;;  %v139_v3 = vmul.f32 %v994_v1, %v994_v1  ;;  %286 = vmatpush1.bf16.msra.mxu1 %v701_v6  ;;  %v704_v10 = vld [vmem:[#allocation7 + $0x20] ss:$8 sps:$4 sm:$0xff]   ;;  %207 = vmatprep.subr.bf16.mxu0 %v705_v8  ;;  %v176_v12 = vld [vmem:[#allocation4] sm:$0xf]  ;;  %v893_v13 = vmov 0  }
  0x58   :  { %135 = vadd.xlane.f32.xlu0 %v134_v2  ;;  %287 = vmatprep.subr.bf16.mxu1 %v702_v7  ;;  %v710_v14 = vld [vmem:[#allocation7 + $0x10] ss:$8 sps:$4 sm:$0xff]   ;;  %v711_v15 = vld [vmem:[#allocation7 + $0x4] ss:$8 sps:$4 sm:$0xff]   ;;  %v713_v16 = vld [vmem:[#allocation7] ss:$8 sps:$4 sm:$0xff]  }
  0x59   :  { %v140_v4 = vsel %vm133_vm0, %v139_v3, 0.0  ;;  %208 = vmatpush1.bf16.msra.mxu0 %v707_v9  ;;  %225 = vmatprep.mubr.bf16.mxu0 %v893_v13  ;;  %v714_v17 = vld [vmem:[#allocation10 + $0x38] sm:$0xff]   ;;  %v894_v18 = vmov 0.0   ;;  %v716_v19 = vld [vmem:[#allocation10 + $0x30] sm:$0xff]   ;;  %v718_v20 = vld [vmem:[#allocation10 + $0x28] sm:$0xff]   ;;  %vm895_vm2 = vmmov 0  }
  0x5a   :  { %309 = vmatprep.mubr.bf16.mxu1 %v893_v13  ;;  %645 = vmatprep.subr.bf16.mxu0 %v894_v18  ;;  %v720_v21 = vld [vmem:[#allocation10 + $0x20] sm:$0xff]   ;;  %v722_v22 = vld [vmem:[#allocation10 + $0x18] sm:$0xff]   ;;  %v724_v23 = vld [vmem:[#allocation10 + $0x10] sm:$0xff]   ;;  %v321_v55 = vshrl.u32 %v320_v54, 7  ;;  %vm572_vm3 = vcmask 7168   ;;  %vm582_vm4 = vcmask 15360  }
  0x5b   :  { %288 = vmatpush1.bf16.msra.mxu1 %v704_v10  ;;  %v592_v33 = vld [vmem:[%s1047_s2] ss:$0 sm:$0xff]  ;;  %v593_v35 = vld [vmem:[#allocation6] ss:$0 sm:$0xff]  ;;  %v715_v39 = vld [vmem:[#allocation12 + $0x38] sm:$0xff]  }
  0x5c   :  { %141 = vadd.xlane.f32.xlu0 %v140_v4  ;;  %596 = vmatmul.mubr.msk.bf16.vlgmr.msra.gmra.mxu0 %vm189_vm1, %v176_v12  ;;  %v717_v41 = vld [vmem:[#allocation12 + $0x30] sm:$0xff]   ;;  %v719_v42 = vld [vmem:[#allocation12 + $0x28] sm:$0xff]   ;;  %v721_v43 = vld [vmem:[#allocation12 + $0x20] sm:$0xff]   ;;  %v322_v56 = vsub.s32 0, %v321_v55  ;;  %v326_v58 = vsub.s32 1, %v321_v55 }
  0x5d   :  { %289 = vmatprep.subr.bf16.mxu1 %v708_v11  ;;  %646 = vmatpush3.bf16.msra.mxu0 %v714_v17  ;;  %v723_v44 = vld [vmem:[#allocation12 + $0x18] sm:$0xff]   ;;  %v725_v49 = vld [vmem:[#allocation12 + $0x10] sm:$0xff]   ;;  %v726_v50 = vld [vmem:[#allocation10 + $0x8] sm:$0xff]  }
  0x5e   :  { %647 = vmatprep.subr.bf16.mxu0 %v894_v18  ;;  %v727_v51 = vld [vmem:[#allocation12 + $0x8] sm:$0xff]   ;;  %v728_v52 = vld [vmem:[#allocation10] sm:$0xff]   ;;  %661 = vmatprep.mubr.msk.bf16.mxu0 %vm895_vm2, %v894_v18 }
  0x5f   :  { %290 = vmatpush1.bf16.msra.mxu1 %v710_v14  ;;  %v729_v53 = vld [vmem:[#allocation12] sm:$0xff]  }
  0x60   :  { %291 = vmatprep.subr.bf16.mxu1 %v711_v15  ;;  %v318_v57 = vld [vmem:[%s1051_s6] sm:$0x3] }
  0x61   :  { %648 = vmatpush3.bf16.msra.mxu0 %v716_v19  ;;  %v323_v59 = vrot.slane %v318_v57, %v322_v56  ;;  %v327_v62 = vrot.slane %v318_v57, %v326_v58  ;;  %v606_v9 = vld [vmem:[%s1054_s9] ss:$0 sm:$0xff]  ;;  %v615_v11 = vld [vmem:[%s1054_s9 + $0x1] ss:$0 sm:$0xff] }
  0x62   :  { %649 = vmatprep.subr.bf16.mxu0 %v894_v18  ;;  %v624_v15 = vld [vmem:[%s1055_s10] ss:$0 sm:$0xff] }
  0x63   :  { %292 = vmatpush1.bf16.msra.mxu1 %v713_v16 }
  0x64   :  { %665 = vmatprep.subr.bf16.mxu1 %v894_v18 }
  0x65   :  { %650 = vmatpush3.bf16.msra.mxu0 %v718_v20 }
  0x66   :  { %651 = vmatprep.subr.bf16.mxu0 %v894_v18 }
  0x69   :  { %652 = vmatpush3.bf16.msra.mxu0 %v720_v21 }
  0x6a   :  { %653 = vmatprep.subr.bf16.mxu0 %v894_v18 }
  0x6d   :  { %654 = vmatpush3.bf16.msra.mxu0 %v722_v22 }
  0x6e   :  { %655 = vmatprep.subr.bf16.mxu0 %v894_v18 }
  0x71   :  { %656 = vmatpush3.bf16.msra.mxu0 %v724_v23 }
  0x72   :  { %657 = vmatprep.subr.bf16.mxu0 %v894_v18 }
  0x75   :  { %658 = vmatpush3.bf16.msra.mxu0 %v726_v50 }
  0x76   :  { %659 = vmatprep.subr.bf16.mxu0 %v894_v18 }
  0x79   :  { %660 = vmatpush3.bf16.msra.mxu0 %v728_v52 }
  0xe1   :  { %v136_v24 = vpop.xlane.xlu0 %135 }
  0xe2   :  { %v138_v25 = vmul.f32 0.015625, %v136_v24  ;;  %v625_v24 = vld [vmem:[%s1055_s10 + $0x1] ss:$0 sm:$0xff] }
  0xe4   :  { %v144_v27 = vmul.f32 %v138_v25, %v138_v25  ;;  %v146_v31 = vsub.f32 %v994_v1, %v138_v25 }
  0xe5   :  { %v142_v26 = vpop.xlane.xlu0 %141 }
  0xe6   :  { %v143_v28 = vmul.f32 0.015625, %v142_v26 }
  0xe8   :  { %v145_v29 = vsub.f32 %v143_v28, %v144_v27  ;;  %v626_v28 = vld [vmem:[%s1056_s11] ss:$0 sm:$0xff] }
  0xea   :  { %v147_v30 = vadd.f32 1e-05, %v145_v29 }
  0xec   :  { %730 = vrsqrt.f32 %v147_v30 }
  0xf9   :  { %v731_v32 = vpop.eup %730 }
  0xfa   :  { %v149_v34 = vmul.f32 %v731_v32, %v146_v31 }
  0xfc   :  { %v157_v36 = vmul.f32 %v592_v33, %v149_v34 }
  0xfe   :  { %v165_v37 = vadd.f32 %v593_v35, %v157_v36 }
 0x100   :  { %732 = vtanh.f32 %v165_v37 }
 0x10d   :  { %v733_v38 = vpop.eup %732 }
 0x10e   :  { %v167_v40 = vpack.c.bf16 %v733_v38, %v733_v38 }
 0x110   :  { %605 = vmatmul.mubr.msk.bf16.vlgmr.msra.gmra.mxu1 %vm133_vm0, %v167_v40 }
 0x111   :  { %666 = vmatpush3.bf16.msra.mxu1 %v715_v39  ;;  %681 = vmatprep.mubr.msk.bf16.mxu1 %vm895_vm2, %v894_v18 }
 0x112   :  { %667 = vmatprep.subr.bf16.mxu1 %v894_v18 }
 0x115   :  { %668 = vmatpush3.bf16.msra.mxu1 %v717_v41 }
 0x116   :  { %669 = vmatprep.subr.bf16.mxu1 %v894_v18 }
 0x119   :  { %670 = vmatpush3.bf16.msra.mxu1 %v719_v42 }
 0x11a   :  { %671 = vmatprep.subr.bf16.mxu1 %v894_v18 }
 0x11c   :  { %v227_v45 = vpop.f32.mrf.mxu0 }
 0x11d   :  { %672 = vmatpush3.bf16.msra.mxu1 %v721_v43 }
 0x11e   :  { %673 = vmatprep.subr.bf16.mxu1 %v894_v18  ;;  %v229_v46 = vpop.f32.mrf.mxu0 }
 0x120   :  { %v231_v47 = vpop.f32.mrf.mxu0 }
 0x121   :  { %674 = vmatpush3.bf16.msra.mxu1 %v723_v44 }
 0x122   :  { %675 = vmatprep.subr.bf16.mxu1 %v894_v18  ;;  %v232_v48 = vpop.f32.mrf.mxu0 }
 0x125   :  { %676 = vmatpush3.bf16.msra.mxu1 %v725_v49 }
 0x126   :  { %677 = vmatprep.subr.bf16.mxu1 %v894_v18 }
 0x129   :  { %678 = vmatpush3.bf16.msra.mxu1 %v727_v51 }
 0x12a   :  { %679 = vmatprep.subr.bf16.mxu1 %v894_v18 }
 0x12d   :  { %680 = vmatpush3.bf16.msra.mxu1 %v729_v53 }
 0x1d0   :  { %v311_v60 = vpop.f32.mrf.mxu1 }
 0x1d1   :  { %v312_v61 = vadd.f32 %v311_v60, %v227_v45 }
 0x1d2   :  { %v313_v63 = vpop.f32.mrf.mxu1 }
 0x1d3   :  { %v330_v0 = vadd.f32 %v323_v59, %v312_v61  ;;  %v314_v1 = vadd.f32 %v313_v63, %v229_v46 }
 0x1d4   :  { %v315_v2 = vpop.f32.mrf.mxu1 }
 0x1d5   :  { %v332_v3 = vmax.f32 %v330_v0, 0.0  ;;  %v331_v4 = vadd.f32 %v327_v62, %v314_v1 }
 0x1d6   :  { %v316_v5 = vpop.f32.mrf.mxu1 }
 0x1d7   :  { %v334_v6 = vpack.c.bf16 %v332_v3, %v332_v3  ;;  %v333_v7 = vmax.f32 %v331_v4, 0.0 }
 0x1d9   :  { %v335_v8 = vpack.c.bf16 %v333_v7, %v333_v7  ;;  %662 = vmatmul.mubr.bf16.vlgmr.msra.gmra.mxu0 %v334_v6 }
 0x1db   :  { %682 = vmatmul.mubr.bf16.vlgmr.msra.gmra.mxu1 %v335_v8 }
 0x299   :  { %v439_v10 = vpop.f32.mrf.mxu0 }
 0x29a   :  { %v440_v12 = vadd.f32 %v606_v9, %v439_v10 }
 0x29b   :  { %v663_v13 = vpop.f32.mrf.mxu0  ;;  %v549_v14 = vpop.f32.mrf.mxu1 }
 0x29c   :  { %v445_v16 = vmax.f32 %v440_v12, 0.0  ;;  %v550_v17 = vadd.f32 %v615_v11, %v549_v14 }
 0x29d   :  { %v442_v18 = vpop.f32.mrf.mxu0  ;;  %v683_v19 = vpop.f32.mrf.mxu1 }
 0x29e   :  { %v555_v20 = vmax.f32 %v550_v17, 0.0  ;;  %v561_v21 = vmul.f32 %v624_v15, %v445_v16 }
 0x29f   :  { %v664_v22 = vpop.f32.mrf.mxu0  ;;  %v552_v23 = vpop.f32.mrf.mxu1 }
 0x2a0   :  { %562 = vadd.xlane.f32.xlu1 %v561_v21  ;;  %v569_v26 = vmul.f32 %v625_v24, %v555_v20 }
 0x2a1   :  { %v684_v25 = vpop.f32.mrf.mxu1 }
 0x2a4   :  { %570 = vadd.xlane.f32.xlu1 %v569_v26 }
 0x329   :  { %v563_v27 = vpop.xlane.xlu1 %562 }
 0x32d   :  { %v571_v29 = vpop.xlane.xlu1 %570 }
 0x32e   :  { %v573_v30 = vsel %vm572_vm3, %v563_v27, %v571_v29 }
 0x32f   :  { %v581_v31 = vadd.f32 %v626_v28, %v573_v30 }
 0x331   :  { %583 = vst.msk [vmem:[%s1057_s12] sm:$0xff] %vm582_vm4, %v581_v31 }
 0x332   :  { %588 = vsyncpa [#allocation3], 1 }
 0x333   :  { %589 = vsyncpa [#allocation5], 1 }
 0x334   :  { %590 = vsyncpa [#allocation8], 1 }
 0x335   :  { %591 = vsyncpa [#allocation11], 1 }

</bundles_post_ra>
